<compile_context>
chip_gen: v6e
topology: v6e:2x2x1
jax: 0.10.0
libtpu: 0.0.40
codegen_flags: <defaults>
</compile_context>

<pallas_src>
import jax
import jax.numpy as jnp
import numpy as np
from jax.experimental import pallas as pl
from jax.experimental.pallas import tpu as pltpu


def _channel_attention_kernel(x_ref, w1t_ref, w2_ref, o_ref):
    """Fused SE-attention for a block of TN images.

    Refs:
      x_ref:   (TN, C, HW)  images; channels in sublanes, spatial in lanes
      w1t_ref: (C, Cmid)    first 1x1 conv weight, pre-transposed & pre-scaled
                            by 1/HW -> (in, out)
      w2_ref:  (C, Cmid)    second 1x1 conv weight, (out, in)
      o_ref:   (TN, C, HW)
    """
    x = x_ref[...].astype(jnp.float32)                            # (TN, C, HW)

    # --- squeeze: global average pool (1/HW folded into w1t) ----------------
    pooled = jnp.sum(x, axis=2, keepdims=True)                    # (TN, C, 1)

    # --- excite fc1: C -> Cmid as VPU MAC + cross-sublane reduction ---------
    h = jnp.sum(w1t_ref[...][None, :, :] * pooled,
                axis=1, keepdims=True)                            # (TN, 1, Cmid)
    h = jnp.maximum(h, 0.0)                                       # ReLU

    # --- excite fc2: Cmid -> C as VPU MAC + small lane reduction ------------
    logits = jnp.sum(w2_ref[...][None, :, :] * h,
                     axis=2, keepdims=True)                       # (TN, C, 1)
    gate = jax.nn.sigmoid(logits)                                 # (TN, C, 1)

    # --- scale: broadcast per-channel gate along the spatial lanes ----------
    o_ref[...] = (x * gate).astype(o_ref.dtype)


def _pick_tn(n, c, hw, itemsize, target_bytes=2 << 20, max_tn=128):
    """Images per grid step: aim for ~2 MiB x-blocks, cap at 128 and at N."""
    per_img = c * hw * itemsize
    tn = max(1, min(max_tn, target_bytes // per_img))
    return int(min(tn, n))


def channel_attention_pallas(x_nchw, w1, w2):
    """x_nchw: (N, C, H, W); w1: (C//r, C); w2: (C, C//r). Returns (N, C, H, W)."""
    N, C, H, W = x_nchw.shape
    Cmid = w1.shape[0]
    HW = H * W
    assert w1.shape == (Cmid, C), w1.shape
    assert w2.shape == (C, Cmid), w2.shape

    x2 = x_nchw.reshape(N, C, HW)                     # pure reshape, no transpose
    # Fold the 1/HW pooling scale into the first FC weight.
    w1t = (jnp.transpose(w1) / HW).astype(jnp.float32)    # (C, Cmid)
    w2f = w2.astype(jnp.float32)                          # (C, Cmid)

    itemsize = jnp.dtype(x_nchw.dtype).itemsize
    TN = _pick_tn(N, C, HW, itemsize)
    n_blocks = pl.cdiv(N, TN)
    N_pad = n_blocks * TN
    if N_pad != N:
        x2 = jnp.pad(x2, ((0, N_pad - N), (0, 0), (0, 0)))

    cost = pl.CostEstimate(
        flops=N * (2 * C * HW + 4 * C * Cmid),
        transcendentals=N * C,
        bytes_accessed=2 * N * C * HW * itemsize + 2 * C * Cmid * 4,
    )

    out = pl.pallas_call(
        _channel_attention_kernel,
        out_shape=jax.ShapeDtypeStruct((N_pad, C, HW), x_nchw.dtype),
        grid=(n_blocks,),
        in_specs=[
            pl.BlockSpec((TN, C, HW), lambda n: (n, 0, 0)),
            pl.BlockSpec((C, Cmid), lambda n: (0, 0)),
            pl.BlockSpec((C, Cmid), lambda n: (0, 0)),
        ],
        out_specs=pl.BlockSpec((TN, C, HW), lambda n: (n, 0, 0)),
        compiler_params=pltpu.CompilerParams(
            dimension_semantics=("parallel",)),
        cost_estimate=cost,
    )(x2, w1t, w2f)

    if N_pad != N:
        out = out[:N]
    return out.reshape(N, C, H, W)


# ---------------------------------------------------------------------------
# Pure-JAX reference for verification (mirrors the PyTorch forward exactly).
# ---------------------------------------------------------------------------

def channel_attention_ref(x, w1, w2):
    pooled = jnp.mean(x, axis=(2, 3), keepdims=True)          # (N, C, 1, 1)
    y = jnp.einsum("oc,nchw->nohw", w1, pooled)               # 1x1 conv, no bias
    y = jnp.maximum(y, 0.0)                                   # ReLU
    y = jnp.einsum("om,nmhw->nohw", w2, y)                    # 1x1 conv, no bias
    y = jax.nn.sigmoid(y)
    return x * y


if __name__ == "__main__":
    # channel must be >= r so channel // r >= 1; pick C=32, r=16 -> Cmid=2.
    N, C, H, W = 2, 32, 16, 16
    R = 16
    Cmid = C // R

    key = jax.random.PRNGKey(0)
    k_x, k_w1, k_w2 = jax.random.split(key, 3)
    x = jax.random.normal(k_x, (N, C, H, W), jnp.float32)
    # Conv2d weights (kernel_size=1, bias=False), squeezed to 2D.
    w1 = jax.random.normal(k_w1, (Cmid, C), jnp.float32) / np.sqrt(C)
    w2 = jax.random.normal(k_w2, (C, Cmid), jnp.float32) / np.sqrt(Cmid)

    out = jax.block_until_ready(channel_attention_pallas(x, w1, w2))
    ref = jax.block_until_ready(channel_attention_ref(x, w1, w2))

    np.testing.assert_allclose(np.asarray(out), np.asarray(ref),
                               rtol=1e-4, atol=1e-5)
    assert out.shape == (N, C, H, W)
    print("KERNEL_OK")
</pallas_src>

<mosaic_0001>
module attributes {stable_mosaic.version = 11 : i64} {
  func.func @_channel_attention_kernel(%arg0: i32, %arg1: memref<2x32x256xf32, #tpu.memory_space<vmem>>, %arg2: memref<32x2xf32, #tpu.memory_space<vmem>>, %arg3: memref<32x2xf32, #tpu.memory_space<vmem>>, %arg4: memref<2x32x256xf32, #tpu.memory_space<vmem>>) attributes {dimension_semantics = [#tpu.dimension_semantics<parallel>], iteration_bounds = array<i64: 1>, scalar_prefetch = 0 : i64, scratch_operands = 0 : i64, tpu.core_type = #tpu.core_type<tc>, window_params = [{transform_indices = @transform_0, window_bounds = array<i64: 2, 32, 256>}, {pipeline_mode = #tpu.pipeline_mode<synchronous>, transform_indices = @transform_1, window_bounds = array<i64: 32, 2>}, {pipeline_mode = #tpu.pipeline_mode<synchronous>, transform_indices = @transform_2, window_bounds = array<i64: 32, 2>}, {transform_indices = @transform_3, window_bounds = array<i64: 2, 32, 256>}]} {
    %c0 = arith.constant 0 : index
    %c0_0 = arith.constant 0 : index
    %c0_1 = arith.constant 0 : index
    %0 = vector.load %arg1[%c0, %c0_0, %c0_1] : memref<2x32x256xf32, #tpu.memory_space<vmem>>, vector<2x32x256xf32>
    %cst = arith.constant dense<0.000000e+00> : vector<2x32xf32>
    %1 = vector.multi_reduction <add>, %0, %cst [2] : vector<2x32x256xf32> to vector<2x32xf32>
    %2 = vector.shape_cast %1 : vector<2x32xf32> to vector<2x32x1xf32>
    %c0_2 = arith.constant 0 : index
    %c0_3 = arith.constant 0 : index
    %3 = vector.load %arg2[%c0_2, %c0_3] : memref<32x2xf32, #tpu.memory_space<vmem>>, vector<32x2xf32>
    %4 = vector.shape_cast %3 : vector<32x2xf32> to vector<1x32x2xf32>
    %5 = vector.broadcast %4 : vector<1x32x2xf32> to vector<2x32x2xf32>
    %6 = vector.broadcast %2 : vector<2x32x1xf32> to vector<2x32x2xf32>
    %7 = arith.mulf %5, %6 : vector<2x32x2xf32>
    %cst_4 = arith.constant dense<0.000000e+00> : vector<2x2xf32>
    %8 = vector.multi_reduction <add>, %7, %cst_4 [1] : vector<2x32x2xf32> to vector<2x2xf32>
    %9 = vector.shape_cast %8 : vector<2x2xf32> to vector<2x1x2xf32>
    %cst_5 = arith.constant 0.000000e+00 : f32
    %10 = vector.broadcast %cst_5 : f32 to vector<2x1x2xf32>
    %11 = arith.maximumf %9, %10 : vector<2x1x2xf32>
    %c0_6 = arith.constant 0 : index
    %c0_7 = arith.constant 0 : index
    %12 = vector.load %arg3[%c0_6, %c0_7] : memref<32x2xf32, #tpu.memory_space<vmem>>, vector<32x2xf32>
    %13 = vector.shape_cast %12 : vector<32x2xf32> to vector<1x32x2xf32>
    %14 = vector.broadcast %13 : vector<1x32x2xf32> to vector<2x32x2xf32>
    %15 = vector.broadcast %11 : vector<2x1x2xf32> to vector<2x32x2xf32>
    %16 = arith.mulf %14, %15 : vector<2x32x2xf32>
    %cst_8 = arith.constant dense<0.000000e+00> : vector<2x32xf32>
    %17 = vector.multi_reduction <add>, %16, %cst_8 [2] : vector<2x32x2xf32> to vector<2x32xf32>
    %18 = vector.shape_cast %17 : vector<2x32xf32> to vector<2x32x1xf32>
    %19 = arith.negf %18 : vector<2x32x1xf32>
    %20 = math.exp %19 : vector<2x32x1xf32>
    %cst_9 = arith.constant 1.000000e+00 : f32
    %21 = vector.broadcast %cst_9 : f32 to vector<2x32x1xf32>
    %22 = arith.addf %21, %20 : vector<2x32x1xf32>
    %23 = arith.divf %21, %22 : vector<2x32x1xf32>
    %24 = vector.broadcast %23 : vector<2x32x1xf32> to vector<2x32x256xf32>
    %25 = arith.mulf %0, %24 : vector<2x32x256xf32>
    %c0_10 = arith.constant 0 : index
    %c0_11 = arith.constant 0 : index
    %c0_12 = arith.constant 0 : index
    %26 = vector.load %arg4[%c0_10, %c0_11, %c0_12] : memref<2x32x256xf32, #tpu.memory_space<vmem>>, vector<2x32x256xf32>
    tpu.vector_store %arg4[%c0_10, %c0_11, %c0_12], %25 {strides = array<i32>} : memref<2x32x256xf32, #tpu.memory_space<vmem>>, vector<2x32x256xf32>,
    return
  }
  func.func @transform_0(%arg0: i32) -> (i32, i32, i32) {
    %c0_i32 = arith.constant 0 : i32
    %c0_i32_0 = arith.constant 0 : i32
    %c0_i32_1 = arith.constant 0 : i32
    return %arg0, %c0_i32, %c0_i32_0 : i32, i32, i32
  }
  func.func @transform_1(%arg0: i32) -> (i32, i32) {
    %c0_i32 = arith.constant 0 : i32
    %c0_i32_0 = arith.constant 0 : i32
    %c0_i32_1 = arith.constant 0 : i32
    return %c0_i32, %c0_i32_0 : i32, i32
  }
  func.func @transform_2(%arg0: i32) -> (i32, i32) {
    %c0_i32 = arith.constant 0 : i32
    %c0_i32_0 = arith.constant 0 : i32
    %c0_i32_1 = arith.constant 0 : i32
    return %c0_i32, %c0_i32_0 : i32, i32
  }
  func.func @transform_3(%arg0: i32) -> (i32, i32, i32) {
    %c0_i32 = arith.constant 0 : i32
    %c0_i32_0 = arith.constant 0 : i32
    %c0_i32_1 = arith.constant 0 : i32
    return %arg0, %c0_i32, %c0_i32_0 : i32, i32, i32
  }
}

</mosaic_0001>

<bundles_post_ra>
// kernel: tpu_custom_call.1
= control target key start
LH: loop header
LB: loop body
LE: loop exit
PB: predicated region body
PF: predicated region fallthrough
CT: control target
= control target key end

     0   :  { %8 = vsyncpa [#allocation3], 0  ;;  %s471_s0 = inlined_call_operand.hbm [shape: f32[2,32,256], index: 0, kind: input, shape index: {}]   ;;  %s472_s1 = inlined_call_operand.vmem [shape: f32[32,2], index: 1, kind: input, shape index: {}]   ;;  %s473_s2 = inlined_call_operand.vmem [shape: f32[32,2], index: 2, kind: input, shape index: {}]   ;;  %s474_s3 = inlined_call_operand.hbm [shape: f32[2,32,256], index: 3, kind: output, shape index: {}]  }
   0x1   :  { %9 = vsyncpa [#allocation4], 0  ;;  %s331_s12 = smov [#allocation2]  }
   0x2   :  { %s15_s13 = sshll.u32 %s331_s12, 4  ;;  %s16_s13 = int_to_ptr.vmem [resolvable:$true] %s15_s13 }
   0x3   :  { %s295_s14 = scalar_lea.vmem %s16_s13, 2048  ;;  %p300_p1 = scmp.lt.s32.totalorder %s16_s13, %s16_s13 }
   0x4   :  { %p296_p0 = scmp.ne.s32.totalorder %s16_s13, %s295_s14  ;;  %p301_p2 = scmp.lt.s32.totalorder %s295_s14, %s295_s14 }
   0x6   :  { %p302_p3 = por %p301_p2, %p300_p1 }
   0x8   :  { %p303_p4 = pnand %p302_p3, %p296_p0 }
   0xa   :  { %306 = shalt.err (!%p303_p4)
}
   0xb   :  { %s332_s15 = smov 256   ;;  %s333_s16 = smov 16  }
   0xc   :  { %21 = dma.hbm_to_vmem [thread:$0]  %s471_s0, 2048, %s16_s13, [#allocation3], %s332_s15, %s332_s15, %s333_s16  }
   0xd   :  { %327 = dma.done.wait [#allocation3], 2048  }
   0xe   :  { %328 = vsyncadd [#allocation3], 4294965248  ;;  %v361_v0 = vld [vmem:[#allocation2 + $0x40] sm:$0xff]  ;;  %v363_v1 = vld [vmem:[#allocation2 + $0x48] sm:$0xff]  ;;  %vm81_vm0 = vcmask 15360  }
   0xf   :  { %v365_v2 = vld [vmem:[#allocation2] sm:$0xff]  ;;  %v57_v3 = vadd.f32 %v363_v1, %v361_v0  ;;  %v369_v4 = vld [vmem:[#allocation2 + $0x8] sm:$0xff]  ;;  %v371_v5 = vld [vmem:[#allocation2 + $0x50] sm:$0xff] }
  0x10   :  { %v373_v6 = vld [vmem:[#allocation2 + $0x58] sm:$0xff]  ;;  %v45_v7 = vadd.f32 %v369_v4, %v365_v2  ;;  %v377_v8 = vld [vmem:[#allocation2 + $0x10] sm:$0xff]  ;;  %v385_v12 = vld [vmem:[#allocation2 + $0x60] sm:$0xff] }
  0x11   :  { %v379_v9 = vld [vmem:[#allocation2 + $0x18] sm:$0xff]  ;;  %58 = vadd.xlane.f32.xlu1 %v57_v3  ;;  %v60_v10 = vadd.f32 %v373_v6, %v371_v5  ;;  %v387_v13 = vld [vmem:[#allocation2 + $0x68] sm:$0xff]  ;;  %v389_v14 = vld [vmem:[#allocation2 + $0x20] sm:$0xff] }
  0x12   :  { %46 = vadd.xlane.f32.xlu0 %v45_v7  ;;  %v48_v11 = vadd.f32 %v379_v9, %v377_v8  ;;  %v391_v15 = vld [vmem:[#allocation2 + $0x28] sm:$0xff]  ;;  %v63_v16 = vadd.f32 %v387_v13, %v385_v12  ;;  %v397_v18 = vld [vmem:[#allocation2 + $0x70] sm:$0xff]  ;;  %v399_v19 = vld [vmem:[#allocation2 + $0x78] sm:$0xff] }
  0x13   :  { %v51_v17 = vadd.f32 %v391_v15, %v389_v14  ;;  %v401_v20 = vld [vmem:[#allocation2 + $0x30] sm:$0xff]  ;;  %v403_v21 = vld [vmem:[#allocation2 + $0x38] sm:$0xff]  ;;  %v66_v22 = vadd.f32 %v399_v19, %v397_v18  ;;  %v69_v24 = vld [vmem:[%s472_s1] sm:$0xff] }
  0x14   :  { %v54_v23 = vadd.f32 %v403_v21, %v401_v20  ;;  %v70_v28 = vld [vmem:[%s472_s1 + $0x8] sm:$0xff]  ;;  %v71_v35 = vld [vmem:[%s472_s1 + $0x10] sm:$0xff]  ;;  %v72_v43 = vld [vmem:[%s472_s1 + $0x18] sm:$0xff] }
  0x15   :  { %61 = vadd.xlane.f32.xlu1 %v60_v10 }
  0x16   :  { %49 = vadd.xlane.f32.xlu0 %v48_v11 }
  0x19   :  { %64 = vadd.xlane.f32.xlu1 %v63_v16 }
  0x1a   :  { %52 = vadd.xlane.f32.xlu0 %v51_v17 }
  0x1d   :  { %67 = vadd.xlane.f32.xlu1 %v66_v22  ;;  %v111_v22 = vld [vmem:[%s473_s2 + $0x8] sm:$0xff] }
  0x1e   :  { %55 = vadd.xlane.f32.xlu0 %v54_v23  ;;  %v110_v23 = vld [vmem:[%s473_s2] sm:$0xff] }
  0x9a   :  { %v59_v25 = vpop.xlane.xlu1 %58 }
  0x9b   :  { %v77_v26 = vmul.f32 %v69_v24, %v59_v25  ;;  %v47_v27 = vpop.xlane.xlu0 %46  ;;  %v113_v25 = vld [vmem:[%s473_s2 + $0x18] sm:$0xff] }
  0x9c   :  { %v73_v36 = vmul.f32 %v69_v24, %v47_v27 }
  0x9d   :  { %v95_v30 = vsel %vm81_vm0, %v77_v26, 0.0  ;;  %v112_v26 = vld [vmem:[%s473_s2 + $0x10] sm:$0xff]  ;;  %s334_s2 = smov [#allocation5]  }
  0x9e   :  { %v62_v29 = vpop.xlane.xlu1 %61  ;;  %v82_v45 = vsel %vm81_vm0, %v73_v36, 0.0  ;;  %s231_s6 = sshll.u32 %s334_s2, 4  ;;  %s232_s6 = int_to_ptr.vmem [resolvable:$true] %s231_s6 }
  0x9f   :  { %v78_v31 = vmul.f32 %v70_v28, %v62_v29  ;;  %v50_v32 = vpop.xlane.xlu0 %49  ;;  %s307_s7 = scalar_lea.vmem %s232_s6, 2048  ;;  %p312_p6 = scmp.lt.s32.totalorder %s232_s6, %s232_s6 }
  0xa0   :  { %v74_v33 = vmul.f32 %v70_v28, %v50_v32  ;;  %p308_p5 = scmp.ne.s32.totalorder %s232_s6, %s307_s7  ;;  %p313_p7 = scmp.lt.s32.totalorder %s307_s7, %s307_s7 }
  0xa1   :  { %v96_v34 = vsel %vm81_vm0, %v78_v31, 0.0 }
  0xa2   :  { %v97_v37 = vadd.f32 %v96_v34, %v95_v30  ;;  %v65_v38 = vpop.xlane.xlu1 %64  ;;  %v83_v41 = vsel %vm81_vm0, %v74_v33, 0.0  ;;  %p314_p8 = por %p313_p7, %p312_p6 }
  0xa3   :  { %v79_v39 = vmul.f32 %v71_v35, %v65_v38  ;;  %v53_v40 = vpop.xlane.xlu0 %52  ;;  %v84_v49 = vadd.f32 %v83_v41, %v82_v45 }
  0xa4   :  { %v75_v42 = vmul.f32 %v71_v35, %v53_v40  ;;  %p315_p9 = pnand %p314_p8, %p308_p5 }
  0xa5   :  { %v98_v44 = vsel %vm81_vm0, %v79_v39, 0.0 }
  0xa6   :  { %v99_v46 = vadd.f32 %v98_v44, %v97_v37  ;;  %v85_v47 = vsel %vm81_vm0, %v75_v42, 0.0  ;;  %v68_v48 = vpop.xlane.xlu1 %67 }
  0xa7   :  { %v80_v50 = vmul.f32 %v72_v43, %v68_v48  ;;  %v56_v51 = vpop.xlane.xlu0 %55  ;;  %v86_v53 = vadd.f32 %v85_v47, %v84_v49 }
  0xa8   :  { %v76_v52 = vmul.f32 %v72_v43, %v56_v51 }
  0xa9   :  { %v100_v54 = vsel %vm81_vm0, %v80_v50, 0.0 }
  0xaa   :  { %v101_v55 = vadd.f32 %v100_v54, %v99_v46  ;;  %v87_v56 = vsel %vm81_vm0, %v76_v52, 0.0 }
  0xab   :  { %v88_v57 = vadd.f32 %v87_v56, %v86_v53 }
  0xac   :  { %v102_v58 = vrot.slane %v101_v55, 4 }
  0xad   :  { %v89_v59 = vrot.slane %v88_v57, 4 }
  0xae   :  { %v103_v60 = vadd.f32 %v102_v58, %v101_v55 }
  0xaf   :  { %v90_v61 = vadd.f32 %v89_v59, %v88_v57 }
  0xb0   :  { %v104_v62 = vrot.slane %v103_v60, 2 }
  0xb1   :  { %v91_v63 = vrot.slane %v90_v61, 2 }
  0xb2   :  { %v105_v3 = vadd.f32 %v104_v62, %v103_v60 }
  0xb3   :  { %v92_v7 = vadd.f32 %v91_v63, %v90_v61 }
  0xb4   :  { %v106_v10 = vrot.slane %v105_v3, 1 }
  0xb5   :  { %v93_v11 = vrot.slane %v92_v7, 1 }
  0xb6   :  { %v107_v17 = vadd.f32 %v106_v10, %v105_v3 }
  0xb7   :  { %v94_v16 = vadd.f32 %v93_v11, %v92_v7 }
  0xb8   :  { %v109_v29 = vmax.f32 %v107_v17, 0.0 }
  0xb9   :  { %v108_v24 = vmax.f32 %v94_v16, 0.0 }
  0xba   :  { %v119_v36 = vmul.f32 %v111_v22, %v109_v29  ;;  %v118_v37 = vmul.f32 %v110_v23, %v109_v29  ;;  %v121_v40 = vmul.f32 %v113_v25, %v109_v29  ;;  %v120_v41 = vmul.f32 %v112_v26, %v109_v29 }
  0xbb   :  { %v115_v27 = vmul.f32 %v111_v22, %v108_v24  ;;  %v114_v28 = vmul.f32 %v110_v23, %v108_v24  ;;  %v117_v32 = vmul.f32 %v113_v25, %v108_v24  ;;  %v116_v33 = vmul.f32 %v112_v26, %v108_v24 }
  0xbc   :  { %v137_v38 = vsel %vm81_vm0, %v119_v36, 0.0  ;;  %v134_v39 = vsel %vm81_vm0, %v118_v37, 0.0  ;;  %v143_v42 = vsel %vm81_vm0, %v121_v40, 0.0  ;;  %v140_v43 = vsel %vm81_vm0, %v120_v41, 0.0 }
  0xbd   :  { %v125_v30 = vsel %vm81_vm0, %v115_v27, 0.0  ;;  %v122_v31 = vsel %vm81_vm0, %v114_v28, 0.0  ;;  %v131_v34 = vsel %vm81_vm0, %v117_v32, 0.0  ;;  %v128_v35 = vsel %vm81_vm0, %v116_v33, 0.0 }
  0xbe   :  { %126 = vadd.xlane.f32.xlu1 %v125_v30  ;;  %123 = vadd.xlane.f32.xlu0 %v122_v31 }
  0xc2   :  { %132 = vadd.xlane.f32.xlu1 %v131_v34  ;;  %129 = vadd.xlane.f32.xlu0 %v128_v35 }
  0xc6   :  { %138 = vadd.xlane.f32.xlu1 %v137_v38  ;;  %135 = vadd.xlane.f32.xlu0 %v134_v39 }
  0xca   :  { %144 = vadd.xlane.f32.xlu1 %v143_v42  ;;  %141 = vadd.xlane.f32.xlu0 %v140_v43 }
 0x147   :  { %v127_v44 = vpop.xlane.xlu1 %126  ;;  %v124_v45 = vpop.xlane.xlu0 %123 }
 0x148   :  { %v244_v46 = vmul.f32 -1.442695, %v127_v44  ;;  %v243_v47 = vmul.f32 -1.442695, %v124_v45 }
 0x14a   :  { %255 = vpow2.f32 %v244_v46 }
 0x14b   :  { %257 = vpow2.f32 %v243_v47  ;;  %v133_v48 = vpop.xlane.xlu1 %132  ;;  %v130_v49 = vpop.xlane.xlu0 %129 }
 0x14c   :  { %v246_v50 = vmul.f32 -1.442695, %v133_v48  ;;  %v245_v51 = vmul.f32 -1.442695, %v130_v49 }
 0x14e   :  { %259 = vpow2.f32 %v246_v50 }
 0x14f   :  { %261 = vpow2.f32 %v245_v51  ;;  %v139_v52 = vpop.xlane.xlu1 %138  ;;  %v136_v53 = vpop.xlane.xlu0 %135 }
 0x150   :  { %v248_v54 = vmul.f32 -1.442695, %v139_v52  ;;  %v247_v55 = vmul.f32 -1.442695, %v136_v53 }
 0x152   :  { %263 = vpow2.f32 %v248_v54 }
 0x153   :  { %265 = vpow2.f32 %v247_v55  ;;  %v145_v56 = vpop.xlane.xlu1 %144  ;;  %v142_v57 = vpop.xlane.xlu0 %141 }
 0x154   :  { %v250_v58 = vmul.f32 -1.442695, %v145_v56  ;;  %v249_v59 = vmul.f32 -1.442695, %v142_v57 }
 0x156   :  { %267 = vpow2.f32 %v250_v58 }
 0x157   :  { %v256_v60 = vpop.eup %255  ;;  %269 = vpow2.f32 %v249_v59 }
 0x158   :  { %v258_v61 = vpop.eup %257  ;;  %v171_v62 = vadd.f32 1.0, %v256_v60 }
 0x159   :  { %v170_v63 = vadd.f32 1.0, %v258_v61 }
 0x15a   :  { %271 = vrcp.f32 %v171_v62 }
 0x15b   :  { %v260_v3 = vpop.eup %259  ;;  %273 = vrcp.f32 %v170_v63 }
 0x15c   :  { %v262_v7 = vpop.eup %261  ;;  %v173_v10 = vadd.f32 1.0, %v260_v3 }
 0x15d   :  { %v172_v11 = vadd.f32 1.0, %v262_v7 }
 0x15e   :  { %275 = vrcp.f32 %v173_v10 }
 0x15f   :  { %v264_v16 = vpop.eup %263  ;;  %277 = vrcp.f32 %v172_v11 }
 0x160   :  { %v266_v17 = vpop.eup %265  ;;  %v175_v22 = vadd.f32 1.0, %v264_v16 }
 0x161   :  { %v174_v23 = vadd.f32 1.0, %v266_v17 }
 0x162   :  { %279 = vrcp.f32 %v175_v22 }
 0x163   :  { %v268_v24 = vpop.eup %267  ;;  %281 = vrcp.f32 %v174_v23 }
 0x164   :  { %v270_v25 = vpop.eup %269  ;;  %v177_v26 = vadd.f32 1.0, %v268_v24 }
 0x165   :  { %v176_v27 = vadd.f32 1.0, %v270_v25 }
 0x166   :  { %283 = vrcp.f32 %v177_v26 }
 0x167   :  { %v272_v28 = vpop.eup %271  ;;  %285 = vrcp.f32 %v176_v27 }
 0x168   :  { %v274_v29 = vpop.eup %273  ;;  %v196_v30 = vmul.f32 %v272_v28, %v377_v8  ;;  %v197_v31 = vmul.f32 %v272_v28, %v379_v9 }
 0x169   :  { %v194_v32 = vmul.f32 %v274_v29, %v365_v2  ;;  %v195_v33 = vmul.f32 %v274_v29, %v369_v4 }
 0x16a   :  { %212 = vst [vmem:[#allocation5 + $0x10] sm:$0xff] %v196_v30  ;;  %213 = vst [vmem:[#allocation5 + $0x18] sm:$0xff] %v197_v31 }
 0x16b   :  { %v276_v34 = vpop.eup %275  ;;  %210 = vst [vmem:[#allocation5] sm:$0xff] %v194_v32  ;;  %211 = vst [vmem:[#allocation5 + $0x8] sm:$0xff] %v195_v33 }
 0x16c   :  { %v278_v35 = vpop.eup %277  ;;  %v200_v36 = vmul.f32 %v276_v34, %v401_v20  ;;  %v201_v37 = vmul.f32 %v276_v34, %v403_v21 }
 0x16d   :  { %v198_v38 = vmul.f32 %v278_v35, %v389_v14  ;;  %v199_v8 = vmul.f32 %v278_v35, %v391_v15 }
 0x16e   :  { %216 = vst [vmem:[#allocation5 + $0x30] sm:$0xff] %v200_v36  ;;  %217 = vst [vmem:[#allocation5 + $0x38] sm:$0xff] %v201_v37 }
 0x16f   :  { %v280_v9 = vpop.eup %279  ;;  %214 = vst [vmem:[#allocation5 + $0x20] sm:$0xff] %v198_v38  ;;  %215 = vst [vmem:[#allocation5 + $0x28] sm:$0xff] %v199_v8 }
 0x170   :  { %v282_v2 = vpop.eup %281  ;;  %v204_v4 = vmul.f32 %v280_v9, %v371_v5  ;;  %v205_v39 = vmul.f32 %v280_v9, %v373_v6 }
 0x171   :  { %v202_v40 = vmul.f32 %v282_v2, %v361_v0  ;;  %v203_v20 = vmul.f32 %v282_v2, %v363_v1 }
 0x172   :  { %220 = vst [vmem:[#allocation5 + $0x50] sm:$0xff] %v204_v4  ;;  %221 = vst [vmem:[#allocation5 + $0x58] sm:$0xff] %v205_v39 }
 0x173   :  { %v284_v14 = vpop.eup %283  ;;  %218 = vst [vmem:[#allocation5 + $0x40] sm:$0xff] %v202_v40  ;;  %219 = vst [vmem:[#allocation5 + $0x48] sm:$0xff] %v203_v20 }
 0x174   :  { %v286_v15 = vpop.eup %285  ;;  %v208_v21 = vmul.f32 %v284_v14, %v397_v18  ;;  %v209_v41 = vmul.f32 %v284_v14, %v399_v19 }
 0x175   :  { %v206_v5 = vmul.f32 %v286_v15, %v385_v12  ;;  %v207_v6 = vmul.f32 %v286_v15, %v387_v13 }
 0x176   :  { %224 = vst [vmem:[#allocation5 + $0x70] sm:$0xff] %v208_v21  ;;  %225 = vst [vmem:[#allocation5 + $0x78] sm:$0xff] %v209_v41 }
 0x177   :  { %222 = vst [vmem:[#allocation5 + $0x60] sm:$0xff] %v206_v5  ;;  %223 = vst [vmem:[#allocation5 + $0x68] sm:$0xff] %v207_v6 }
 0x178   :  { %318 = shalt.err (!%p315_p9)
}
 0x179   :  { %237 = dma.vmem_to_hbm [thread:$0]  %s232_s6, 2048, %s474_s3, [#allocation4], %s332_s15, %s332_s15, %s333_s16  }
 0x17a   :  { %329 = dma.done.wait [#allocation4], 2048  }
 0x17b   :  { %330 = vsyncadd [#allocation4], 4294965248 }
 0x17c   :  { %241 = vsyncpa [#allocation3], 1 }
 0x17d   :  { %242 = vsyncpa [#allocation4], 1 }

</bundles_post_ra>
